<compile_context>
chip_gen: v7x
topology: tpu7x:2x2x1
jax: 0.10.0
libtpu: 0.0.40
codegen_flags: <defaults>
</compile_context>

<pallas_src>
import jax
import jax.numpy as jnp
from jax.experimental import pallas as pl
from jax.experimental.pallas import tpu as pltpu

# ---------------------------------------------------------------------------
# Model configuration (small shapes consistent with the module structure).
# Original module uses img_shape=(3,128,128); we use (3,16,16) for a small,
# fast synthetic run. num_classes = 3 as in the reference.
# ---------------------------------------------------------------------------
NUM_CLASSES = 3
IMG_SHAPE = (3, 16, 16)                       # (C, H, W) used by the model
FLAT_IMG = IMG_SHAPE[0] * IMG_SHAPE[1] * IMG_SHAPE[2]   # 768 = 6*128 (MXU aligned)
H1, H2 = 512, 256
ONE_HOT_PAD = 8                               # label one-hot padded to 8 lanes


def _round_up(x, m):
    return (x + m - 1) // m * m


def _leaky_relu(x, slope=0.2):
    return jnp.where(x >= 0.0, x, slope * x)


def _disc_kernel(x_ref, oh_ref, cb_ref, w1_ref, w2_ref, b2_ref, w3_ref, b3_ref,
                 o_ref):
    """One batch tile of the MLP, everything VMEM-resident.

    x_ref  : (TB, 768)  bf16   flattened image tile
    oh_ref : (TB, 8)    bf16   label one-hot (padded to 8 lanes)
    cb_ref : (8, 512)   bf16   per-class bias table = emb @ w1_tail + b1
    w1_ref : (768, 512) bf16
    w2_ref : (512, 256) bf16
    b2_ref : (1, 256)   f32
    w3_ref : (1, 256)   f32    third Linear as a row (N=1 -> VPU mul + XLU sum)
    b3_ref : (1,)       f32    SMEM scalar
    o_ref  : (TB, 1)    f32    sigmoid output column (4 B/row, no broadcast)
    """
    # Layer 1: MXU matmul (bf16 x bf16 -> f32 acc) + tiny one-hot MXU dot that
    # injects the folded per-class bias (replaces the f32 row_bias stream).
    h = jnp.dot(x_ref[...], w1_ref[...], preferred_element_type=jnp.float32)
    h = h + jnp.dot(oh_ref[...], cb_ref[...], preferred_element_type=jnp.float32)
    h = _leaky_relu(h)                                          # (TB, 512) f32

    # Layer 2: MXU matmul, activations cast to bf16 for the MXU.
    h = jnp.dot(h.astype(jnp.bfloat16), w2_ref[...],
                preferred_element_type=jnp.float32) + b2_ref[...]
    h = _leaky_relu(h)                                          # (TB, 256) f32

    # Layer 3 (out_features=1): VPU elementwise mul + XLU lane reduction
    # instead of a 1-column matmul that would waste the MXU.
    logit = jnp.sum(h * w3_ref[...], axis=-1, keepdims=True) + b3_ref[0]

    # Sigmoid: exp and reciprocal both go to the EUP slot (off the VALU path).
    e = jnp.exp(-logit)                                         # (TB, 1) f32
    o_ref[...] = pl.reciprocal(1.0 + e, approx=True)


@jax.jit
def discriminator_forward(img, labels, params):
    """img: (B, C>=3, H, W) float32 NCHW; labels: (B,) int32 -> (B, 1) float32."""
    img = img[:, :3, :, :]                                  # keep first 3 channels
    b = img.shape[0]
    flat = img.reshape(b, -1).astype(jnp.bfloat16)          # (B, 768) NCHW flatten

    # Fold the 3-wide embedding tail of the first Linear into a per-class bias
    # table (tiny JAX-side GEMM: (3,3)@(3,512)), padded to 8 rows / bf16.  The
    # per-row selection happens in-kernel via the one-hot MXU dot.
    cls_bias = (params["emb"] @ params["w1_tail"]) + params["b1"]    # (3, 512) f32
    cls_bias = jnp.pad(cls_bias, ((0, ONE_HOT_PAD - NUM_CLASSES), (0, 0)))
    cls_bias = cls_bias.astype(jnp.bfloat16)                         # (8, 512)
    onehot = jax.nn.one_hot(labels, ONE_HOT_PAD, dtype=jnp.bfloat16)  # (B, 8)

    # Batch tiling: ensure >= 2 grid steps for moderate B (both TCs on v7x),
    # 128-row tiles once B is large.  Padded rows compute garbage that is
    # sliced off below.
    if b >= 256:
        tile_b = 128
    else:
        tile_b = max(8, _round_up((b + 1) // 2, 8))
    b_pad = _round_up(b, tile_b)
    if b_pad != b:
        flat = jnp.pad(flat, ((0, b_pad - b), (0, 0)))
        onehot = jnp.pad(onehot, ((0, b_pad - b), (0, 0)))
    grid = (b_pad // tile_b,)

    const = lambda i: (0, 0)                  # weights resident across batch tiles
    single = pl.Buffered(1)                   # constant index_map -> 1 buffer

    out_padded = pl.pallas_call(
        _disc_kernel,
        out_shape=jax.ShapeDtypeStruct((b_pad, 1), jnp.float32),
        grid=grid,
        in_specs=[
            pl.BlockSpec((tile_b, FLAT_IMG), lambda i: (i, 0)),           # x
            pl.BlockSpec((tile_b, ONE_HOT_PAD), lambda i: (i, 0)),        # one-hot
            pl.BlockSpec((ONE_HOT_PAD, H1), const, pipeline_mode=single),  # cls_bias
            pl.BlockSpec((FLAT_IMG, H1), const, pipeline_mode=single),     # w1 bf16
            pl.BlockSpec((H1, H2), const, pipeline_mode=single),           # w2 bf16
            pl.BlockSpec((1, H2), const, pipeline_mode=single),            # b2
            pl.BlockSpec((1, H2), const, pipeline_mode=single),            # w3 row
            pl.BlockSpec(memory_space=pltpu.MemorySpace.SMEM),             # b3 scalar
        ],
        out_specs=pl.BlockSpec((tile_b, 1), lambda i: (i, 0)),
        compiler_params=pltpu.CompilerParams(
            dimension_semantics=("parallel",)),               # both TCs on v7x
    )(
        flat, onehot, cls_bias,
        params["w1"], params["w2"], params["b2"], params["w3"], params["b3"],
    )
    return out_padded[:b]                                     # (B, 1)


def _reference_forward(img, labels, params):
    """Pure-JAX f32 reference mirroring the PyTorch module (for tolerance check)."""
    img = img[:, :3, :, :]
    b = img.shape[0]
    flat = img.reshape(b, -1).astype(jnp.float32)                       # (B, 768)
    emb = params["emb"][labels]                                         # (B, 3)
    d_in = jnp.concatenate([flat, emb], axis=-1)                        # (B, 771)
    w1_full = jnp.concatenate(
        [params["w1"].astype(jnp.float32), params["w1_tail"]], axis=0)  # (771, 512)
    h = d_in @ w1_full + params["b1"]
    h = jnp.where(h >= 0.0, h, 0.2 * h)
    h = h @ params["w2"].astype(jnp.float32) + params["b2"]
    h = jnp.where(h >= 0.0, h, 0.2 * h)
    logit = h @ params["w3"].T + params["b3"]                           # (B, 1)
    return jax.nn.sigmoid(logit)


def init_params(key):
    """Deterministic synthetic parameters (shapes from the module __init__).

    Linear weights are stored transposed, i.e. (in_features, out_features),
    so the kernel computes x @ W + b (== PyTorch x @ W_pt.T + b). The first
    Linear is split into the 768 image rows (bf16, fed to the kernel) and the
    3 embedding rows (f32 `w1_tail`, folded into the per-class bias table).
    """
    ks = jax.random.split(key, 8)

    def u(k, shape, fan_in):
        bound = 1.0 / jnp.sqrt(fan_in)
        return jax.random.uniform(k, shape, jnp.float32, -bound, bound)

    d_in = FLAT_IMG + NUM_CLASSES
    return {
        "emb": jax.random.normal(ks[0], (NUM_CLASSES, NUM_CLASSES), jnp.float32),
        "w1": u(ks[1], (FLAT_IMG, H1), d_in).astype(jnp.bfloat16),
        "w1_tail": u(ks[2], (NUM_CLASSES, H1), d_in),
        "b1": u(ks[3], (1, H1), d_in),
        "w2": u(ks[4], (H1, H2), H1).astype(jnp.bfloat16),
        "b2": u(ks[5], (1, H2), H1),
        "w3": u(ks[6], (1, H2), H2),          # third Linear stored as a row
        "b3": u(ks[7], (1,), H2),             # scalar bias (SMEM in the kernel)
    }


if __name__ == "__main__":
    key = jax.random.PRNGKey(0)
    k_img, k_lab, k_par = jax.random.split(key, 3)

    B = 2
    # Input has 4 channels; forward slices to the first 3 (as in the module).
    img = jax.random.normal(k_img, (B, 4, IMG_SHAPE[1], IMG_SHAPE[2]), jnp.float32)
    labels = jax.random.randint(k_lab, (B,), 0, NUM_CLASSES, jnp.int32)
    params = init_params(k_par)

    out = jax.block_until_ready(discriminator_forward(img, labels, params))
    assert out.shape == (B, 1), out.shape
    assert bool(jnp.all((out > -1e-3) & (out < 1.0 + 1e-3)))

    # Tolerance check against the pure-JAX f32 reference (bf16 MXU operands and
    # the approx reciprocal are the only deviations).
    ref = _reference_forward(img, labels, params)
    assert jnp.allclose(out, ref, atol=2e-2), (out, ref)
    print("KERNEL_OK")
</pallas_src>

<mosaic_0001>
module attributes {stable_mosaic.version = 11 : i64} {
  func.func @_disc_kernel(%arg0: i32, %arg1: memref<8x768xbf16, #tpu.memory_space<vmem>>, %arg2: memref<8x8xbf16, #tpu.memory_space<vmem>>, %arg3: memref<8x512xbf16, #tpu.memory_space<vmem>>, %arg4: memref<768x512xbf16, #tpu.memory_space<vmem>>, %arg5: memref<512x256xbf16, #tpu.memory_space<vmem>>, %arg6: memref<1x256xf32, #tpu.memory_space<vmem>>, %arg7: memref<1x256xf32, #tpu.memory_space<vmem>>, %arg8: memref<1xf32, #tpu.memory_space<smem>>, %arg9: memref<8x1xf32, #tpu.memory_space<vmem>>) attributes {dimension_semantics = [#tpu.dimension_semantics<parallel>], iteration_bounds = array<i64: 1>, scalar_prefetch = 0 : i64, scratch_operands = 0 : i64, tpu.core_type = #tpu.core_type<tc>, window_params = [{transform_indices = @transform_0, window_bounds = array<i64: 8, 768>}, {transform_indices = @transform_1, window_bounds = array<i64: 8, 8>}, {pipeline_mode = #tpu.pipeline_mode<synchronous>, transform_indices = @transform_2, window_bounds = array<i64: 8, 512>}, {pipeline_mode = #tpu.pipeline_mode<synchronous>, transform_indices = @transform_3, window_bounds = array<i64: 768, 512>}, {pipeline_mode = #tpu.pipeline_mode<synchronous>, transform_indices = @transform_4, window_bounds = array<i64: 512, 256>}, {pipeline_mode = #tpu.pipeline_mode<synchronous>, transform_indices = @transform_5, window_bounds = array<i64: 1, 256>}, {pipeline_mode = #tpu.pipeline_mode<synchronous>, transform_indices = @transform_6, window_bounds = array<i64: 1, 256>}, {transform_indices = @transform_7, window_bounds = array<i64: 1>}, {transform_indices = @transform_8, window_bounds = array<i64: 8, 1>}]} {
    %c0 = arith.constant 0 : index
    %c0_0 = arith.constant 0 : index
    %0 = vector.load %arg1[%c0, %c0_0] : memref<8x768xbf16, #tpu.memory_space<vmem>>, vector<8x768xbf16>
    %c0_1 = arith.constant 0 : index
    %c0_2 = arith.constant 0 : index
    %1 = vector.load %arg4[%c0_1, %c0_2] : memref<768x512xbf16, #tpu.memory_space<vmem>>, vector<768x512xbf16>
    %cst = arith.constant dense<0.000000e+00> : vector<8x512xf32>
    %2 = tpu.matmul %0, %1, %cst {dimension_numbers = #tpu.dot_dimension_numbers<[1], [0], [0], [1], [0, 0, 1, 1], [], []>} : vector<8x768xbf16>, vector<768x512xbf16>, vector<8x512xf32> -> vector<8x512xf32>
    %c0_3 = arith.constant 0 : index
    %c0_4 = arith.constant 0 : index
    %3 = vector.load %arg2[%c0_3, %c0_4] : memref<8x8xbf16, #tpu.memory_space<vmem>>, vector<8x8xbf16>
    %c0_5 = arith.constant 0 : index
    %c0_6 = arith.constant 0 : index
    %4 = vector.load %arg3[%c0_5, %c0_6] : memref<8x512xbf16, #tpu.memory_space<vmem>>, vector<8x512xbf16>
    %cst_7 = arith.constant dense<0.000000e+00> : vector<8x512xf32>
    %5 = tpu.matmul %3, %4, %cst_7 {dimension_numbers = #tpu.dot_dimension_numbers<[1], [0], [0], [1], [0, 0, 1, 1], [], []>} : vector<8x8xbf16>, vector<8x512xbf16>, vector<8x512xf32> -> vector<8x512xf32>
    %6 = arith.addf %2, %5 : vector<8x512xf32>
    %cst_8 = arith.constant 0.000000e+00 : f32
    %7 = vector.broadcast %cst_8 : f32 to vector<8x512xf32>
    %8 = arith.cmpf oge, %6, %7 : vector<8x512xf32>
    %cst_9 = arith.constant 2.000000e-01 : f32
    %9 = vector.broadcast %cst_9 : f32 to vector<8x512xf32>
    %10 = arith.mulf %9, %6 : vector<8x512xf32>
    %11 = arith.select %8, %6, %10 : vector<8x512xi1>, vector<8x512xf32>
    %12 = arith.truncf %11 : vector<8x512xf32> to vector<8x512xbf16>
    %c0_10 = arith.constant 0 : index
    %c0_11 = arith.constant 0 : index
    %13 = vector.load %arg5[%c0_10, %c0_11] : memref<512x256xbf16, #tpu.memory_space<vmem>>, vector<512x256xbf16>
    %cst_12 = arith.constant dense<0.000000e+00> : vector<8x256xf32>
    %14 = tpu.matmul %12, %13, %cst_12 {dimension_numbers = #tpu.dot_dimension_numbers<[1], [0], [0], [1], [0, 0, 1, 1], [], []>} : vector<8x512xbf16>, vector<512x256xbf16>, vector<8x256xf32> -> vector<8x256xf32>
    %c0_13 = arith.constant 0 : index
    %c0_14 = arith.constant 0 : index
    %15 = vector.load %arg6[%c0_13, %c0_14] : memref<1x256xf32, #tpu.memory_space<vmem>>, vector<1x256xf32>
    %16 = vector.broadcast %15 : vector<1x256xf32> to vector<8x256xf32>
    %17 = arith.addf %14, %16 : vector<8x256xf32>
    %cst_15 = arith.constant 0.000000e+00 : f32
    %18 = vector.broadcast %cst_15 : f32 to vector<8x256xf32>
    %19 = arith.cmpf oge, %17, %18 : vector<8x256xf32>
    %cst_16 = arith.constant 2.000000e-01 : f32
    %20 = vector.broadcast %cst_16 : f32 to vector<8x256xf32>
    %21 = arith.mulf %20, %17 : vector<8x256xf32>
    %22 = arith.select %19, %17, %21 : vector<8x256xi1>, vector<8x256xf32>
    %c0_17 = arith.constant 0 : index
    %c0_18 = arith.constant 0 : index
    %23 = vector.load %arg7[%c0_17, %c0_18] : memref<1x256xf32, #tpu.memory_space<vmem>>, vector<1x256xf32>
    %24 = vector.broadcast %23 : vector<1x256xf32> to vector<8x256xf32>
    %25 = arith.mulf %22, %24 : vector<8x256xf32>
    %cst_19 = arith.constant dense<0.000000e+00> : vector<8xf32>
    %26 = vector.multi_reduction <add>, %25, %cst_19 [1] : vector<8x256xf32> to vector<8xf32>
    %27 = vector.shape_cast %26 : vector<8xf32> to vector<8x1xf32>
    %c0_20 = arith.constant 0 : index
    %28 = memref.load %arg8[%c0_20] : memref<1xf32, #tpu.memory_space<smem>>
    %29 = vector.broadcast %28 : f32 to vector<8x1xf32>
    %30 = arith.addf %27, %29 : vector<8x1xf32>
    %cst_21 = arith.constant 0.000000e+00 : f32
    %31 = vector.broadcast %cst_21 : f32 to vector<8x1xf32>
    %32 = arith.subf %31, %30 : vector<8x1xf32>
    %33 = math.exp %32 : vector<8x1xf32>
    %cst_22 = arith.constant 1.000000e+00 : f32
    %34 = vector.broadcast %cst_22 : f32 to vector<8x1xf32>
    %35 = arith.addf %34, %33 : vector<8x1xf32>
    %36 = tpu.reciprocal %35 {approx = true} : vector<8x1xf32> -> vector<8x1xf32>
    %c0_23 = arith.constant 0 : index
    %c0_24 = arith.constant 0 : index
    %37 = vector.load %arg9[%c0_23, %c0_24] : memref<8x1xf32, #tpu.memory_space<vmem>>, vector<8x1xf32>
    tpu.vector_store %arg9[%c0_23, %c0_24], %36 {strides = array<i32>} : memref<8x1xf32, #tpu.memory_space<vmem>>, vector<8x1xf32>,
    return
  }
  func.func @transform_0(%arg0: i32) -> (i32, i32) {
    %c0_i32 = arith.constant 0 : i32
    %c0_i32_0 = arith.constant 0 : i32
    return %arg0, %c0_i32 : i32, i32
  }
  func.func @transform_1(%arg0: i32) -> (i32, i32) {
    %c0_i32 = arith.constant 0 : i32
    %c0_i32_0 = arith.constant 0 : i32
    return %arg0, %c0_i32 : i32, i32
  }
  func.func @transform_2(%arg0: i32) -> (i32, i32) {
    %c0_i32 = arith.constant 0 : i32
    %c0_i32_0 = arith.constant 0 : i32
    %c0_i32_1 = arith.constant 0 : i32
    return %c0_i32, %c0_i32_0 : i32, i32
  }
  func.func @transform_3(%arg0: i32) -> (i32, i32) {
    %c0_i32 = arith.constant 0 : i32
    %c0_i32_0 = arith.constant 0 : i32
    %c0_i32_1 = arith.constant 0 : i32
    return %c0_i32, %c0_i32_0 : i32, i32
  }
  func.func @transform_4(%arg0: i32) -> (i32, i32) {
    %c0_i32 = arith.constant 0 : i32
    %c0_i32_0 = arith.constant 0 : i32
    %c0_i32_1 = arith.constant 0 : i32
    return %c0_i32, %c0_i32_0 : i32, i32
  }
  func.func @transform_5(%arg0: i32) -> (i32, i32) {
    %c0_i32 = arith.constant 0 : i32
    %c0_i32_0 = arith.constant 0 : i32
    %c0_i32_1 = arith.constant 0 : i32
    return %c0_i32, %c0_i32_0 : i32, i32
  }
  func.func @transform_6(%arg0: i32) -> (i32, i32) {
    %c0_i32 = arith.constant 0 : i32
    %c0_i32_0 = arith.constant 0 : i32
    %c0_i32_1 = arith.constant 0 : i32
    return %c0_i32, %c0_i32_0 : i32, i32
  }
  func.func @transform_7(%arg0: i32) -> i32 {
    %c0_i32 = arith.constant 0 : i32
    %c0_i32_0 = arith.constant 0 : i32
    return %c0_i32 : i32
  }
  func.func @transform_8(%arg0: i32) -> (i32, i32) {
    %c0_i32 = arith.constant 0 : i32
    %c0_i32_0 = arith.constant 0 : i32
    return %arg0, %c0_i32 : i32, i32
  }
}

</mosaic_0001>

<bundles_post_ra>
// kernel: discriminator_forward.1
= control target key start
LH: loop header
LB: loop body
LE: loop exit
PB: predicated region body
PF: predicated region fallthrough
CT: control target
= control target key end

     0   :  { %14 = vsyncpa [#allocation4], 0  ;;  %s3011_s0 = inlined_call_operand.vmem [shape: bf16[8,768], index: 0, kind: input, shape index: {}]   ;;  %s3012_s1 = inlined_call_operand.vmem [shape: bf16[8,8], index: 1, kind: input, shape index: {}]   ;;  %s3013_s2 = inlined_call_operand.vmem [shape: bf16[8,512], index: 2, kind: input, shape index: {}]   ;;  %s3014_s3 = inlined_call_operand.hbm [shape: bf16[768,512], index: 3, kind: input, shape index: {}]   ;;  %s3015_s4 = inlined_call_operand.hbm [shape: bf16[512,256], index: 4, kind: input, shape index: {}]   ;;  %s3016_s5 = inlined_call_operand.vmem [shape: f32[1,256], index: 5, kind: input, shape index: {}]   ;;  %s3017_s6 = inlined_call_operand.vmem [shape: f32[1,256], index: 6, kind: input, shape index: {}]   ;;  %s3018_s7 = inlined_call_operand.<no memory space> [shape: f32[1], index: 7, kind: input, shape index: {}]   ;;  %s3019_s8 = inlined_call_operand.vmem [shape: f32[8,1], index: 8, kind: output, shape index: {}]  }
   0x1   :  { %15 = vsyncpa [#allocation6], 0  ;;  %s2875_s27 = smov [#allocation3]   ;;  %s2827_s9 = scalar_lea.hbm %s3014_s3, 24576 }
   0x2   :  { %s27_s28 = sshll.u32 %s2875_s27, 4  ;;  %p2828_p0 = scmp.ne.s32.totalorder %s3014_s3, %s2827_s9  ;;  %s28_s28 = int_to_ptr.vmem [resolvable:$true] %s27_s28 }
   0x3   :  { %p2831_p1 = scmp.lt.u32.totalorder %s2827_s9, %s3014_s3 }
   0x5   :  { %p2833_p2 = pnand %p2831_p1, %p2828_p0 }
   0x7   :  { %2836 = shalt.err (!%p2833_p2)
}
   0x8   :  { %s2837_s14 = scalar_lea.vmem %s28_s28, 24576  ;;  %p2842_p4 = scmp.lt.s32.totalorder %s28_s28, %s28_s28 }
   0x9   :  { %p2838_p3 = scmp.ne.s32.totalorder %s28_s28, %s2837_s14  ;;  %p2843_p5 = scmp.lt.s32.totalorder %s2837_s14, %s2837_s14 }
   0xb   :  { %p2844_p6 = por %p2843_p5, %p2842_p4 }
   0xd   :  { %p2845_p7 = pnand %p2844_p6, %p2838_p3 }
   0xf   :  { %2848 = shalt.err (!%p2845_p7)
}
  0x10   :  { %s2876_s15 = smov 256   ;;  %s2877_s16 = smov 16  }
  0x11   :  { %33 = dma.hbm_to_vmem [thread:$0]  %s3014_s3, 24576, %s28_s28, [#allocation4], %s2876_s15, %s2876_s15, %s2877_s16  }
  0x12   :  { %s2878_s19 = smov [#allocation5]   ;;  %s2849_s23 = scalar_lea.hbm %s3015_s4, 8192 }
  0x13   :  { %s39_s20 = sshll.u32 %s2878_s19, 4  ;;  %p2850_p8 = scmp.ne.s32.totalorder %s3015_s4, %s2849_s23  ;;  %s40_s20 = int_to_ptr.vmem [resolvable:$true] %s39_s20 }
  0x14   :  { %p2853_p9 = scmp.lt.u32.totalorder %s2849_s23, %s3015_s4 }
  0x16   :  { %p2855_p10 = pnand %p2853_p9, %p2850_p8 }
  0x18   :  { %2858 = shalt.err (!%p2855_p10)
}
  0x19   :  { %s2859_s29 = scalar_lea.vmem %s40_s20, 8192  ;;  %p2864_p12 = scmp.lt.s32.totalorder %s40_s20, %s40_s20 }
  0x1a   :  { %p2860_p11 = scmp.ne.s32.totalorder %s40_s20, %s2859_s29  ;;  %p2865_p13 = scmp.lt.s32.totalorder %s2859_s29, %s2859_s29 }
  0x1c   :  { %p2866_p0 = por %p2865_p13, %p2864_p12 }
  0x1e   :  { %p2867_p1 = pnand %p2866_p0, %p2860_p11 }
  0x20   :  { %2870 = shalt.err (!%p2867_p1)
}
  0x21   :  { %s2879_s3 = smov 128   ;;  %s2880_s28 = smov 8  }
  0x22   :  { %45 = dma.hbm_to_vmem [thread:$0]  %s3015_s4, 8192, %s40_s20, [#allocation6], %s2879_s3, %s2879_s3, %s2880_s28  }
  0x23   :  { %2871 = dma.done.wait [#allocation4], 24576  }
  0x24   :  { %2872 = vsyncadd [#allocation4], 4294942720 }
  0x25   :  { %2873 = dma.done.wait [#allocation6], 8192  }
  0x26   :  { %2874 = vsyncadd [#allocation6], 4294959104  ;;  %v2881_v0 = vmov 0   ;;  %v255_v1 = vld [vmem:[%s3013_s2] sm:$0xff]  ;;  %vm271_vm0 = vcmask 1043456   ;;  %v256_v2 = vld [vmem:[%s3013_s2 + $0x8] sm:$0xff] }
  0x27   :  { %316 = vmatprep.mubr.bf16.mxu0 %v2881_v0  ;;  %357 = vmatprep.mubr.bf16.mxu1 %v2881_v0  ;;  %v2127_v3 = vcombine.high %v255_v1, %v255_v1  ;;  %v2129_v4 = vcombine.high %v256_v2, %v256_v2  ;;  %v2126_v5 = vcombine.low %v255_v1, %v255_v1  ;;  %v2435_v7 = vld [vmem:[#allocation3 + $0x4] ss:$16 sps:$4 sm:$0xff]   ;;  %v2433_v8 = vld [vmem:[#allocation3] ss:$16 sps:$4 sm:$0xff]   ;;  %vm267_vm1 = vcmask 64512   ;;  %v60_v55 = vld [vmem:[%s3011_s0 + $0x8] sm:$0xff] }
  0x28   :  { %v2128_v6 = vcombine.low %v256_v2, %v256_v2  ;;  %v2436_v11 = vld [vmem:[#allocation3 + $0x200] ss:$16 sps:$4 sm:$0xff]   ;;  %v2438_v12 = vld [vmem:[#allocation3 + $0x204] ss:$16 sps:$4 sm:$0xff]   ;;  %v2968_v59 = vcombine.high %v60_v55, %v60_v55  ;;  %vm2118_vm8 = vcmask 7168  }
  0x29   :  { %2130 = vmatprep.subr.msk.bf16.mxu0 %vm271_vm0, %v2127_v3  ;;  %2132 = vmatprep.subr.msk.bf16.mxu1 %vm271_vm0, %v2129_v4  ;;  %v273_v9 = vsel %vm271_vm0, %v2126_v5, 0  ;;  %v254_v13 = vld [vmem:[%s3012_s1] sm:$0xf]  ;;  %v2441_v14 = vld [vmem:[#allocation3 + $0x24] ss:$16 sps:$4 sm:$0xff]  }
  0x2a   :  { %v279_v10 = vsel %vm271_vm0, %v2128_v6, 0  ;;  %285 = vmatpush1.bf16.msra.mxu0 %v273_v9  ;;  %v2444_v15 = vld [vmem:[#allocation3 + $0x224] ss:$16 sps:$4 sm:$0xff]   ;;  %v2439_v16 = vld [vmem:[#allocation3 + $0x20] ss:$16 sps:$4 sm:$0xff]  }
  0x2b   :  { %326 = vmatpush1.bf16.msra.mxu1 %v279_v10  ;;  %1388 = vmatprep.subr.bf16.mxu0 %v2438_v12  ;;  %v2442_v17 = vld [vmem:[#allocation3 + $0x220] ss:$16 sps:$4 sm:$0xff]   ;;  %v2447_v18 = vld [vmem:[#allocation3 + $0x44] ss:$16 sps:$4 sm:$0xff]  }
  0x2c   :  { %1347 = vmatprep.subr.bf16.mxu1 %v2435_v7  ;;  %v2450_v19 = vld [vmem:[#allocation3 + $0x244] ss:$16 sps:$4 sm:$0xff]   ;;  %v2445_v20 = vld [vmem:[#allocation3 + $0x40] ss:$16 sps:$4 sm:$0xff]  }
  0x2d   :  { %2131 = vmatmul.mubr.msk.bf16.vlgmr.msra.gmra.mrb[0].mxu0 %vm267_vm1, %v254_v13  ;;  %v2448_v21 = vld [vmem:[#allocation3 + $0x240] ss:$16 sps:$4 sm:$0xff]   ;;  %v2453_v22 = vld [vmem:[#allocation3 + $0x64] ss:$16 sps:$4 sm:$0xff]  }
  0x2e   :  { %2133 = vmatmul.mubr.msk.bf16.vlgmr.msra.gmra.mrb[0].mxu1 %vm267_vm1, %v254_v13  ;;  %1389 = vmatpush1.bf16.msra.mxu0 %v2436_v11  ;;  %v2456_v23 = vld [vmem:[#allocation3 + $0x264] ss:$16 sps:$4 sm:$0xff]   ;;  %v2451_v24 = vld [vmem:[#allocation3 + $0x60] ss:$16 sps:$4 sm:$0xff]  }
  0x2f   :  { %1348 = vmatpush1.bf16.msra.mxu1 %v2433_v8  ;;  %1390 = vmatprep.subr.bf16.mxu0 %v2444_v15  ;;  %v2454_v25 = vld [vmem:[#allocation3 + $0x260] ss:$16 sps:$4 sm:$0xff]   ;;  %v2459_v26 = vld [vmem:[#allocation3 + $0x84] ss:$16 sps:$4 sm:$0xff]   ;;  %v2538_v15 = vld [vmem:[#allocation3 + $0xc] ss:$16 sps:$4 sm:$0xff]  }
  0x30   :  { %1349 = vmatprep.subr.bf16.mxu1 %v2441_v14  ;;  %v2462_v27 = vld [vmem:[#allocation3 + $0x284] ss:$16 sps:$4 sm:$0xff]   ;;  %v2457_v28 = vld [vmem:[#allocation3 + $0x80] ss:$16 sps:$4 sm:$0xff]   ;;  %1420 = vmatprep.mubr.bf16.mxu0 %v2968_v59 }
  0x31   :  { %v2460_v29 = vld [vmem:[#allocation3 + $0x280] ss:$16 sps:$4 sm:$0xff]   ;;  %v2465_v30 = vld [vmem:[#allocation3 + $0xa4] ss:$16 sps:$4 sm:$0xff]  }
  0x32   :  { %1391 = vmatpush1.bf16.msra.mxu0 %v2442_v17  ;;  %v2468_v31 = vld [vmem:[#allocation3 + $0x2a4] ss:$16 sps:$4 sm:$0xff]   ;;  %v2463_v32 = vld [vmem:[#allocation3 + $0xa0] ss:$16 sps:$4 sm:$0xff]   ;;  %v2974_v17 = vcombine.low %v60_v55, %v60_v55  ;;  %v2592_v55 = vld [vmem:[#allocation3 + $0x12c] ss:$16 sps:$4 sm:$0xff]  }
  0x33   :  { %1350 = vmatpush1.bf16.msra.mxu1 %v2439_v16  ;;  %1392 = vmatprep.subr.bf16.mxu0 %v2450_v19  ;;  %v2466_v33 = vld [vmem:[#allocation3 + $0x2a0] ss:$16 sps:$4 sm:$0xff]   ;;  %v2471_v34 = vld [vmem:[#allocation3 + $0xc4] ss:$16 sps:$4 sm:$0xff]   ;;  %v2536_v19 = vld [vmem:[#allocation3 + $0x8] ss:$16 sps:$4 sm:$0xff]  }
  0x34   :  { %1351 = vmatprep.subr.bf16.mxu1 %v2447_v18  ;;  %v2474_v35 = vld [vmem:[#allocation3 + $0x2c4] ss:$16 sps:$4 sm:$0xff]   ;;  %v2469_v36 = vld [vmem:[#allocation3 + $0xc0] ss:$16 sps:$4 sm:$0xff]  }
  0x35   :  { %v2472_v37 = vld [vmem:[#allocation3 + $0x2c0] ss:$16 sps:$4 sm:$0xff]   ;;  %v2477_v38 = vld [vmem:[#allocation3 + $0xe4] ss:$16 sps:$4 sm:$0xff]  }
  0x36   :  { %1393 = vmatpush1.bf16.msra.mxu0 %v2448_v21  ;;  %v2480_v39 = vld [vmem:[#allocation3 + $0x2e4] ss:$16 sps:$4 sm:$0xff]   ;;  %v2475_v40 = vld [vmem:[#allocation3 + $0xe0] ss:$16 sps:$4 sm:$0xff]   ;;  %v2544_v21 = vld [vmem:[#allocation3 + $0x2c] ss:$16 sps:$4 sm:$0xff]  }
  0x37   :  { %1352 = vmatpush1.bf16.msra.mxu1 %v2445_v20  ;;  %1394 = vmatprep.subr.bf16.mxu0 %v2456_v23  ;;  %v2478_v41 = vld [vmem:[#allocation3 + $0x2e0] ss:$16 sps:$4 sm:$0xff]   ;;  %v2483_v42 = vld [vmem:[#allocation3 + $0x104] ss:$16 sps:$4 sm:$0xff]   ;;  %v2542_v23 = vld [vmem:[#allocation3 + $0x28] ss:$16 sps:$4 sm:$0xff]  }
  0x38   :  { %1353 = vmatprep.subr.bf16.mxu1 %v2453_v22  ;;  %v2486_v43 = vld [vmem:[#allocation3 + $0x304] ss:$16 sps:$4 sm:$0xff]   ;;  %v2481_v44 = vld [vmem:[#allocation3 + $0x100] ss:$16 sps:$4 sm:$0xff]  }
  0x39   :  { %v2484_v45 = vld [vmem:[#allocation3 + $0x300] ss:$16 sps:$4 sm:$0xff]   ;;  %v2489_v46 = vld [vmem:[#allocation3 + $0x124] ss:$16 sps:$4 sm:$0xff]  }
  0x3a   :  { %1395 = vmatpush1.bf16.msra.mxu0 %v2454_v25  ;;  %v2492_v47 = vld [vmem:[#allocation3 + $0x324] ss:$16 sps:$4 sm:$0xff]   ;;  %v2487_v48 = vld [vmem:[#allocation3 + $0x120] ss:$16 sps:$4 sm:$0xff]   ;;  %v2550_v25 = vld [vmem:[#allocation3 + $0x4c] ss:$16 sps:$4 sm:$0xff]  }
  0x3b   :  { %1354 = vmatpush1.bf16.msra.mxu1 %v2451_v24  ;;  %1396 = vmatprep.subr.bf16.mxu0 %v2462_v27  ;;  %v2490_v49 = vld [vmem:[#allocation3 + $0x320] ss:$16 sps:$4 sm:$0xff]   ;;  %v2495_v50 = vld [vmem:[#allocation3 + $0x144] ss:$16 sps:$4 sm:$0xff]   ;;  %v2548_v27 = vld [vmem:[#allocation3 + $0x48] ss:$16 sps:$4 sm:$0xff]  }
  0x3c   :  { %1355 = vmatprep.subr.bf16.mxu1 %v2459_v26  ;;  %v2498_v51 = vld [vmem:[#allocation3 + $0x344] ss:$16 sps:$4 sm:$0xff]   ;;  %v2493_v52 = vld [vmem:[#allocation3 + $0x140] ss:$16 sps:$4 sm:$0xff]  }
  0x3d   :  { %v2496_v53 = vld [vmem:[#allocation3 + $0x340] ss:$16 sps:$4 sm:$0xff]   ;;  %v2501_v56 = vld [vmem:[#allocation3 + $0x164] ss:$16 sps:$4 sm:$0xff]  }
  0x3e   :  { %1397 = vmatpush1.bf16.msra.mxu0 %v2460_v29  ;;  %v59_v54 = vld [vmem:[%s3011_s0] sm:$0xff]  ;;  %v2556_v29 = vld [vmem:[#allocation3 + $0x6c] ss:$16 sps:$4 sm:$0xff]  }
  0x3f   :  { %1356 = vmatpush1.bf16.msra.mxu1 %v2457_v28  ;;  %1398 = vmatprep.subr.bf16.mxu0 %v2468_v31  ;;  %v2504_v57 = vld [vmem:[#allocation3 + $0x364] ss:$16 sps:$4 sm:$0xff]   ;;  %v2966_v58 = vcombine.high %v59_v54, %v59_v54  ;;  %v2499_v60 = vld [vmem:[#allocation3 + $0x160] ss:$16 sps:$4 sm:$0xff]   ;;  %v2972_v16 = vcombine.low %v59_v54, %v59_v54  ;;  %v2554_v31 = vld [vmem:[#allocation3 + $0x68] ss:$16 sps:$4 sm:$0xff]  }
  0x40   :  { %1357 = vmatprep.subr.bf16.mxu1 %v2465_v30  ;;  %v2502_v61 = vld [vmem:[#allocation3 + $0x360] ss:$16 sps:$4 sm:$0xff]   ;;  %v2507_v62 = vld [vmem:[#allocation3 + $0x184] ss:$16 sps:$4 sm:$0xff]  }
  0x41   :  { %1379 = vmatprep.mubr.bf16.mxu1 %v2966_v58  ;;  %v2510_v63 = vld [vmem:[#allocation3 + $0x384] ss:$16 sps:$4 sm:$0xff]   ;;  %v2505_v0 = vld [vmem:[#allocation3 + $0x180] ss:$16 sps:$4 sm:$0xff]  }
  0x42   :  { %1399 = vmatpush1.bf16.msra.mxu0 %v2466_v33  ;;  %v2508_v1 = vld [vmem:[#allocation3 + $0x380] ss:$16 sps:$4 sm:$0xff]   ;;  %v2513_v2 = vld [vmem:[#allocation3 + $0x1a4] ss:$16 sps:$4 sm:$0xff]   ;;  %v2562_v33 = vld [vmem:[#allocation3 + $0x8c] ss:$16 sps:$4 sm:$0xff]  }
  0x43   :  { %1358 = vmatpush1.bf16.msra.mxu1 %v2463_v32  ;;  %1400 = vmatprep.subr.bf16.mxu0 %v2474_v35  ;;  %v2516_v3 = vld [vmem:[#allocation3 + $0x3a4] ss:$16 sps:$4 sm:$0xff]   ;;  %v2511_v4 = vld [vmem:[#allocation3 + $0x1a0] ss:$16 sps:$4 sm:$0xff]   ;;  %v2560_v35 = vld [vmem:[#allocation3 + $0x88] ss:$16 sps:$4 sm:$0xff]  }
  0x44   :  { %1359 = vmatprep.subr.bf16.mxu1 %v2471_v34  ;;  %v2514_v5 = vld [vmem:[#allocation3 + $0x3a0] ss:$16 sps:$4 sm:$0xff]   ;;  %v2519_v6 = vld [vmem:[#allocation3 + $0x1c4] ss:$16 sps:$4 sm:$0xff]  }
  0x45   :  { %v2522_v7 = vld [vmem:[#allocation3 + $0x3c4] ss:$16 sps:$4 sm:$0xff]   ;;  %v2517_v8 = vld [vmem:[#allocation3 + $0x1c0] ss:$16 sps:$4 sm:$0xff]  }
  0x46   :  { %1401 = vmatpush1.bf16.msra.mxu0 %v2472_v37  ;;  %v2520_v9 = vld [vmem:[#allocation3 + $0x3c0] ss:$16 sps:$4 sm:$0xff]   ;;  %v2525_v10 = vld [vmem:[#allocation3 + $0x1e4] ss:$16 sps:$4 sm:$0xff]   ;;  %v2568_v37 = vld [vmem:[#allocation3 + $0xac] ss:$16 sps:$4 sm:$0xff]  }
  0x47   :  { %1360 = vmatpush1.bf16.msra.mxu1 %v2469_v36  ;;  %1402 = vmatprep.subr.bf16.mxu0 %v2480_v39  ;;  %v2528_v11 = vld [vmem:[#allocation3 + $0x3e4] ss:$16 sps:$4 sm:$0xff]   ;;  %v2523_v12 = vld [vmem:[#allocation3 + $0x1e0] ss:$16 sps:$4 sm:$0xff]  }
  0x48   :  { %1361 = vmatprep.subr.bf16.mxu1 %v2477_v38  ;;  %v2526_v13 = vld [vmem:[#allocation3 + $0x3e0] ss:$16 sps:$4 sm:$0xff]   ;;  %v2535_v14 = vld [vmem:[#allocation3 + $0x404] ss:$16 sps:$4 sm:$0xff]  }
  0x49   :  { %v2533_v18 = vld [vmem:[#allocation3 + $0x400] ss:$16 sps:$4 sm:$0xff]   ;;  %v2541_v20 = vld [vmem:[#allocation3 + $0x424] ss:$16 sps:$4 sm:$0xff]  }
  0x4a   :  { %1403 = vmatpush1.bf16.msra.mxu0 %v2478_v41  ;;  %v2539_v22 = vld [vmem:[#allocation3 + $0x420] ss:$16 sps:$4 sm:$0xff]   ;;  %v2547_v24 = vld [vmem:[#allocation3 + $0x444] ss:$16 sps:$4 sm:$0xff]  }
  0x4b   :  { %1362 = vmatpush1.bf16.msra.mxu1 %v2475_v40  ;;  %1404 = vmatprep.subr.bf16.mxu0 %v2486_v43  ;;  %v2545_v26 = vld [vmem:[#allocation3 + $0x440] ss:$16 sps:$4 sm:$0xff]   ;;  %v2553_v28 = vld [vmem:[#allocation3 + $0x464] ss:$16 sps:$4 sm:$0xff]   ;;  %v2566_v40 = vld [vmem:[#allocation3 + $0xa8] ss:$16 sps:$4 sm:$0xff]  }
  0x4c   :  { %1363 = vmatprep.subr.bf16.mxu1 %v2483_v42  ;;  %v2551_v30 = vld [vmem:[#allocation3 + $0x460] ss:$16 sps:$4 sm:$0xff]   ;;  %v2559_v32 = vld [vmem:[#allocation3 + $0x484] ss:$16 sps:$4 sm:$0xff]   ;;  %v2574_v43 = vld [vmem:[#allocation3 + $0xcc] ss:$16 sps:$4 sm:$0xff]  }
  0x4d   :  { %v2557_v34 = vld [vmem:[#allocation3 + $0x480] ss:$16 sps:$4 sm:$0xff]   ;;  %v2565_v36 = vld [vmem:[#allocation3 + $0x4a4] ss:$16 sps:$4 sm:$0xff]  }
  0x4e   :  { %1405 = vmatpush1.bf16.msra.mxu0 %v2484_v45  ;;  %v2563_v38 = vld [vmem:[#allocation3 + $0x4a0] ss:$16 sps:$4 sm:$0xff]   ;;  %v2571_v41 = vld [vmem:[#allocation3 + $0x4c4] ss:$16 sps:$4 sm:$0xff]   ;;  %v2572_v45 = vld [vmem:[#allocation3 + $0xc8] ss:$16 sps:$4 sm:$0xff]  }
  0x4f   :  { %1364 = vmatpush1.bf16.msra.mxu1 %v2481_v44  ;;  %1406 = vmatprep.subr.bf16.mxu0 %v2492_v47  ;;  %v2982_v39 = vld [vmem:[%s3011_s0 + $0x10] sm:$0xff]  ;;  %v2580_v47 = vld [vmem:[#allocation3 + $0xec] ss:$16 sps:$4 sm:$0xff]  }
  0x50   :  { %1365 = vmatprep.subr.bf16.mxu1 %v2489_v46  ;;  %v2986_v42 = vcombine.high %v2982_v39, %v2982_v39  ;;  %v2569_v44 = vld [vmem:[#allocation3 + $0x4c0] ss:$16 sps:$4 sm:$0xff]   ;;  %v2577_v46 = vld [vmem:[#allocation3 + $0x4e4] ss:$16 sps:$4 sm:$0xff]  }
  0x51   :  { %v2589_v54 = vld [vmem:[#allocation3 + $0x524] ss:$16 sps:$4 sm:$0xff]  }
  0x52   :  { %1407 = vmatpush1.bf16.msra.mxu0 %v2490_v49  ;;  %v2578_v49 = vld [vmem:[#allocation3 + $0xe8] ss:$16 sps:$4 sm:$0xff]  }
  0x53   :  { %1366 = vmatpush1.bf16.msra.mxu1 %v2487_v48  ;;  %1408 = vmatprep.subr.bf16.mxu0 %v2498_v51  ;;  %v2575_v48 = vld [vmem:[#allocation3 + $0x4e0] ss:$16 sps:$4 sm:$0xff]   ;;  %v2586_v51 = vld [vmem:[#allocation3 + $0x10c] ss:$16 sps:$4 sm:$0xff]  }
  0x54   :  { %1367 = vmatprep.subr.bf16.mxu1 %v2495_v50  ;;  %v2583_v50 = vld [vmem:[#allocation3 + $0x504] ss:$16 sps:$4 sm:$0xff]  }
  0x56   :  { %1409 = vmatpush1.bf16.msra.mxu0 %v2496_v53  ;;  %v2584_v53 = vld [vmem:[#allocation3 + $0x108] ss:$16 sps:$4 sm:$0xff]  }
  0x57   :  { %1368 = vmatpush1.bf16.msra.mxu1 %v2493_v52  ;;  %1410 = vmatprep.subr.bf16.mxu0 %v2504_v57  ;;  %v2581_v52 = vld [vmem:[#allocation3 + $0x500] ss:$16 sps:$4 sm:$0xff]   ;;  %v2590_v57 = vld [vmem:[#allocation3 + $0x128] ss:$16 sps:$4 sm:$0xff]  }
  0x58   :  { %1369 = vmatprep.subr.bf16.mxu1 %v2501_v56  ;;  %v2587_v56 = vld [vmem:[#allocation3 + $0x520] ss:$16 sps:$4 sm:$0xff]  }
  0x5a   :  { %1411 = vmatpush1.bf16.msra.mxu0 %v2502_v61  ;;  %v2593_v61 = vld [vmem:[#allocation3 + $0x540] ss:$16 sps:$4 sm:$0xff]  }
  0x5b   :  { %1370 = vmatpush1.bf16.msra.mxu1 %v2499_v60  ;;  %1412 = vmatprep.subr.bf16.mxu0 %v2510_v63  ;;  %v2598_v60 = vld [vmem:[#allocation3 + $0x14c] ss:$16 sps:$4 sm:$0xff]   ;;  %v2601_v63 = vld [vmem:[#allocation3 + $0x564] ss:$16 sps:$4 sm:$0xff]  }
  0x5c   :  { %1371 = vmatprep.subr.bf16.mxu1 %v2507_v62  ;;  %v2596_v62 = vld [vmem:[#allocation3 + $0x148] ss:$16 sps:$4 sm:$0xff]  }
  0x5e   :  { %1413 = vmatpush1.bf16.msra.mxu0 %v2508_v1  ;;  %v2599_v1 = vld [vmem:[#allocation3 + $0x560] ss:$16 sps:$4 sm:$0xff]  }
  0x5f   :  { %1372 = vmatpush1.bf16.msra.mxu1 %v2505_v0  ;;  %1414 = vmatprep.subr.bf16.mxu0 %v2516_v3  ;;  %v2604_v0 = vld [vmem:[#allocation3 + $0x16c] ss:$16 sps:$4 sm:$0xff]   ;;  %v2607_v3 = vld [vmem:[#allocation3 + $0x584] ss:$16 sps:$4 sm:$0xff]  }
  0x60   :  { %1373 = vmatprep.subr.bf16.mxu1 %v2513_v2  ;;  %v2602_v2 = vld [vmem:[#allocation3 + $0x168] ss:$16 sps:$4 sm:$0xff]  }
  0x62   :  { %1415 = vmatpush1.bf16.msra.mxu0 %v2514_v5  ;;  %v2605_v5 = vld [vmem:[#allocation3 + $0x580] ss:$16 sps:$4 sm:$0xff]  }
  0x63   :  { %1374 = vmatpush1.bf16.msra.mxu1 %v2511_v4  ;;  %1416 = vmatprep.subr.bf16.mxu0 %v2522_v7  ;;  %v2610_v4 = vld [vmem:[#allocation3 + $0x18c] ss:$16 sps:$4 sm:$0xff]   ;;  %v2613_v7 = vld [vmem:[#allocation3 + $0x5a4] ss:$16 sps:$4 sm:$0xff]  }
  0x64   :  { %1375 = vmatprep.subr.bf16.mxu1 %v2519_v6  ;;  %v2608_v6 = vld [vmem:[#allocation3 + $0x188] ss:$16 sps:$4 sm:$0xff]  }
  0x66   :  { %1417 = vmatpush1.bf16.msra.mxu0 %v2520_v9  ;;  %v2611_v9 = vld [vmem:[#allocation3 + $0x5a0] ss:$16 sps:$4 sm:$0xff]  }
  0x67   :  { %1376 = vmatpush1.bf16.msra.mxu1 %v2517_v8  ;;  %1418 = vmatprep.subr.bf16.mxu0 %v2528_v11  ;;  %v2616_v8 = vld [vmem:[#allocation3 + $0x1ac] ss:$16 sps:$4 sm:$0xff]   ;;  %v2619_v11 = vld [vmem:[#allocation3 + $0x5c4] ss:$16 sps:$4 sm:$0xff]  }
  0x68   :  { %1377 = vmatprep.subr.bf16.mxu1 %v2525_v10  ;;  %v2614_v10 = vld [vmem:[#allocation3 + $0x1a8] ss:$16 sps:$4 sm:$0xff]  }
  0x6a   :  { %1419 = vmatpush1.bf16.msra.mxu0 %v2526_v13  ;;  %v2617_v13 = vld [vmem:[#allocation3 + $0x5c0] ss:$16 sps:$4 sm:$0xff]  }
  0x6b   :  { %1378 = vmatpush1.bf16.msra.mxu1 %v2523_v12  ;;  %1429 = vmatprep.subr.bf16.mxu0 %v2535_v14  ;;  %v2622_v12 = vld [vmem:[#allocation3 + $0x1cc] ss:$16 sps:$4 sm:$0xff]   ;;  %v2620_v14 = vld [vmem:[#allocation3 + $0x1c8] ss:$16 sps:$4 sm:$0xff]  }
  0x6c   :  { %1470 = vmatprep.subr.bf16.mxu1 %v2538_v15  ;;  %v2625_v15 = vld [vmem:[#allocation3 + $0x5e4] ss:$16 sps:$4 sm:$0xff]  }
  0x6d   :  { %1421 = vmatmul.mubr.bf16.vlgmr.msra.gmra.mrb[4].mxu0 %v2974_v17 }
  0x6e   :  { %1380 = vmatmul.mubr.bf16.vlgmr.msra.gmra.mrb[4].mxu1 %v2972_v16  ;;  %1430 = vmatpush1.bf16.msra.mxu0 %v2533_v18  ;;  %v2628_v18 = vld [vmem:[#allocation3 + $0x1ec] ss:$16 sps:$4 sm:$0xff]  }
  0x6f   :  { %1471 = vmatpush1.bf16.msra.mxu1 %v2536_v19  ;;  %1431 = vmatprep.subr.bf16.mxu0 %v2541_v20  ;;  %v2623_v19 = vld [vmem:[#allocation3 + $0x5e0] ss:$16 sps:$4 sm:$0xff]   ;;  %v2626_v20 = vld [vmem:[#allocation3 + $0x1e8] ss:$16 sps:$4 sm:$0xff]  }
  0x70   :  { %1472 = vmatprep.subr.bf16.mxu1 %v2544_v21  ;;  %1502 = vmatprep.mubr.bf16.mxu1 %v2966_v58  ;;  %v2595_v58 = vld [vmem:[#allocation3 + $0x544] ss:$16 sps:$4 sm:$0xff]   ;;  %v2633_v21 = vld [vmem:[#allocation3 + $0x20c] ss:$16 sps:$4 sm:$0xff]  }
  0x71   :  { %1461 = vmatprep.mubr.bf16.mxu0 %v2986_v42 }
  0x72   :  { %1432 = vmatpush1.bf16.msra.mxu0 %v2539_v22  ;;  %v2631_v22 = vld [vmem:[#allocation3 + $0x208] ss:$16 sps:$4 sm:$0xff]  }
  0x73   :  { %1473 = vmatpush1.bf16.msra.mxu1 %v2542_v23  ;;  %1433 = vmatprep.subr.bf16.mxu0 %v2547_v24  ;;  %v2991_v23 = vcombine.low %v2982_v39, %v2982_v39  ;;  %v2636_v24 = vld [vmem:[#allocation3 + $0x22c] ss:$16 sps:$4 sm:$0xff]   ;;  %v2730_v39 = vld [vmem:[#allocation5 + $0x10] ss:$8 sps:$4 sm:$0xff]  }
  0x74   :  { %1474 = vmatprep.subr.bf16.mxu1 %v2550_v25  ;;  %v2634_v25 = vld [vmem:[#allocation3 + $0x228] ss:$16 sps:$4 sm:$0xff]  }
  0x76   :  { %1434 = vmatpush1.bf16.msra.mxu0 %v2545_v26  ;;  %v2639_v26 = vld [vmem:[#allocation3 + $0x24c] ss:$16 sps:$4 sm:$0xff]  }
  0x77   :  { %1475 = vmatpush1.bf16.msra.mxu1 %v2548_v27  ;;  %1435 = vmatprep.subr.bf16.mxu0 %v2553_v28  ;;  %v2637_v27 = vld [vmem:[#allocation3 + $0x248] ss:$16 sps:$4 sm:$0xff]   ;;  %v2642_v28 = vld [vmem:[#allocation3 + $0x26c] ss:$16 sps:$4 sm:$0xff]  }
  0x78   :  { %1476 = vmatprep.subr.bf16.mxu1 %v2556_v29  ;;  %v2640_v29 = vld [vmem:[#allocation3 + $0x268] ss:$16 sps:$4 sm:$0xff]  }
  0x7a   :  { %1436 = vmatpush1.bf16.msra.mxu0 %v2551_v30  ;;  %v2645_v30 = vld [vmem:[#allocation3 + $0x28c] ss:$16 sps:$4 sm:$0xff]  }
  0x7b   :  { %1477 = vmatpush1.bf16.msra.mxu1 %v2554_v31  ;;  %1437 = vmatprep.subr.bf16.mxu0 %v2559_v32  ;;  %v2643_v31 = vld [vmem:[#allocation3 + $0x288] ss:$16 sps:$4 sm:$0xff]   ;;  %v2648_v32 = vld [vmem:[#allocation3 + $0x2ac] ss:$16 sps:$4 sm:$0xff]  }
  0x7c   :  { %1478 = vmatprep.subr.bf16.mxu1 %v2562_v33  ;;  %v2646_v33 = vld [vmem:[#allocation3 + $0x2a8] ss:$16 sps:$4 sm:$0xff]  }
  0x7e   :  { %1438 = vmatpush1.bf16.msra.mxu0 %v2557_v34  ;;  %v2649_v34 = vld [vmem:[#allocation3 + $0x2c8] ss:$16 sps:$4 sm:$0xff]  }
  0x7f   :  { %1479 = vmatpush1.bf16.msra.mxu1 %v2560_v35  ;;  %1439 = vmatprep.subr.bf16.mxu0 %v2565_v36  ;;  %v2727_v35 = vld [vmem:[#allocation5] ss:$8 sps:$4 sm:$0xff]   ;;  %v2729_v36 = vld [vmem:[#allocation5 + $0x4] ss:$8 sps:$4 sm:$0xff]  }
  0x80   :  { %1480 = vmatprep.subr.bf16.mxu1 %v2568_v37  ;;  %v2732_v37 = vld [vmem:[#allocation5 + $0x14] ss:$8 sps:$4 sm:$0xff]  }
  0x82   :  { %1440 = vmatpush1.bf16.msra.mxu0 %v2563_v38  ;;  %v2652_v38 = vld [vmem:[#allocation3 + $0x2e8] ss:$16 sps:$4 sm:$0xff]  }
  0x83   :  { %1481 = vmatpush1.bf16.msra.mxu1 %v2566_v40  ;;  %1441 = vmatprep.subr.bf16.mxu0 %v2571_v41  ;;  %v2657_v40 = vld [vmem:[#allocation3 + $0x30c] ss:$16 sps:$4 sm:$0xff]  }
  0x84   :  { %1482 = vmatprep.subr.bf16.mxu1 %v2574_v43  ;;  %v2735_v41 = vld [vmem:[#allocation5 + $0x24] ss:$8 sps:$4 sm:$0xff]   ;;  %v2655_v43 = vld [vmem:[#allocation3 + $0x308] ss:$16 sps:$4 sm:$0xff]  }
  0x86   :  { %1442 = vmatpush1.bf16.msra.mxu0 %v2569_v44  ;;  %v2733_v44 = vld [vmem:[#allocation5 + $0x20] ss:$8 sps:$4 sm:$0xff]  }
  0x87   :  { %1483 = vmatpush1.bf16.msra.mxu1 %v2572_v45  ;;  %1443 = vmatprep.subr.bf16.mxu0 %v2577_v46  ;;  %v2660_v45 = vld [vmem:[#allocation3 + $0x32c] ss:$16 sps:$4 sm:$0xff]  }
  0x88   :  { %1484 = vmatprep.subr.bf16.mxu1 %v2580_v47  ;;  %v2738_v46 = vld [vmem:[#allocation5 + $0x34] ss:$8 sps:$4 sm:$0xff]   ;;  %v2658_v47 = vld [vmem:[#allocation3 + $0x328] ss:$16 sps:$4 sm:$0xff]  }
  0x8a   :  { %1444 = vmatpush1.bf16.msra.mxu0 %v2575_v48  ;;  %v2736_v48 = vld [vmem:[#allocation5 + $0x30] ss:$8 sps:$4 sm:$0xff]  }
  0x8b   :  { %1485 = vmatpush1.bf16.msra.mxu1 %v2578_v49  ;;  %1445 = vmatprep.subr.bf16.mxu0 %v2583_v50  ;;  %v2663_v49 = vld [vmem:[#allocation3 + $0x34c] ss:$16 sps:$4 sm:$0xff]  }
  0x8c   :  { %1486 = vmatprep.subr.bf16.mxu1 %v2586_v51  ;;  %v2741_v50 = vld [vmem:[#allocation5 + $0x44] ss:$8 sps:$4 sm:$0xff]   ;;  %v2661_v51 = vld [vmem:[#allocation3 + $0x348] ss:$16 sps:$4 sm:$0xff]  }
  0x8e   :  { %1446 = vmatpush1.bf16.msra.mxu0 %v2581_v52  ;;  %v2739_v52 = vld [vmem:[#allocation5 + $0x40] ss:$8 sps:$4 sm:$0xff]  }
  0x8f   :  { %1487 = vmatpush1.bf16.msra.mxu1 %v2584_v53  ;;  %1447 = vmatprep.subr.bf16.mxu0 %v2589_v54  ;;  %v2666_v53 = vld [vmem:[#allocation3 + $0x36c] ss:$16 sps:$4 sm:$0xff]  }
  0x90   :  { %1488 = vmatprep.subr.bf16.mxu1 %v2592_v55  ;;  %v2744_v54 = vld [vmem:[#allocation5 + $0x54] ss:$8 sps:$4 sm:$0xff]   ;;  %v2664_v55 = vld [vmem:[#allocation3 + $0x368] ss:$16 sps:$4 sm:$0xff]  }
  0x92   :  { %1448 = vmatpush1.bf16.msra.mxu0 %v2587_v56  ;;  %v2742_v56 = vld [vmem:[#allocation5 + $0x50] ss:$8 sps:$4 sm:$0xff]  }
  0x93   :  { %1489 = vmatpush1.bf16.msra.mxu1 %v2590_v57  ;;  %1449 = vmatprep.subr.bf16.mxu0 %v2595_v58  ;;  %v2669_v57 = vld [vmem:[#allocation3 + $0x38c] ss:$16 sps:$4 sm:$0xff]  }
  0x94   :  { %1490 = vmatprep.subr.bf16.mxu1 %v2598_v60  ;;  %v2747_v58 = vld [vmem:[#allocation5 + $0x64] ss:$8 sps:$4 sm:$0xff]   ;;  %v2667_v60 = vld [vmem:[#allocation3 + $0x388] ss:$16 sps:$4 sm:$0xff]  }
  0x96   :  { %1450 = vmatpush1.bf16.msra.mxu0 %v2593_v61  ;;  %v2745_v61 = vld [vmem:[#allocation5 + $0x60] ss:$8 sps:$4 sm:$0xff]  }
  0x97   :  { %1491 = vmatpush1.bf16.msra.mxu1 %v2596_v62  ;;  %1451 = vmatprep.subr.bf16.mxu0 %v2601_v63  ;;  %v2672_v62 = vld [vmem:[#allocation3 + $0x3ac] ss:$16 sps:$4 sm:$0xff]  }
  0x98   :  { %1492 = vmatprep.subr.bf16.mxu1 %v2604_v0  ;;  %v2750_v63 = vld [vmem:[#allocation5 + $0x74] ss:$8 sps:$4 sm:$0xff]   ;;  %v2670_v0 = vld [vmem:[#allocation3 + $0x3a8] ss:$16 sps:$4 sm:$0xff]  }
  0x9a   :  { %1452 = vmatpush1.bf16.msra.mxu0 %v2599_v1  ;;  %v2748_v1 = vld [vmem:[#allocation5 + $0x70] ss:$8 sps:$4 sm:$0xff]  }
  0x9b   :  { %1493 = vmatpush1.bf16.msra.mxu1 %v2602_v2  ;;  %1453 = vmatprep.subr.bf16.mxu0 %v2607_v3  ;;  %v2675_v2 = vld [vmem:[#allocation3 + $0x3cc] ss:$16 sps:$4 sm:$0xff]  }
  0x9c   :  { %1494 = vmatprep.subr.bf16.mxu1 %v2610_v4  ;;  %v2753_v3 = vld [vmem:[#allocation5 + $0x84] ss:$8 sps:$4 sm:$0xff]   ;;  %v2673_v4 = vld [vmem:[#allocation3 + $0x3c8] ss:$16 sps:$4 sm:$0xff]  }
  0x9e   :  { %1454 = vmatpush1.bf16.msra.mxu0 %v2605_v5  ;;  %v2751_v5 = vld [vmem:[#allocation5 + $0x80] ss:$8 sps:$4 sm:$0xff]  }
  0x9f   :  { %1495 = vmatpush1.bf16.msra.mxu1 %v2608_v6  ;;  %1455 = vmatprep.subr.bf16.mxu0 %v2613_v7  ;;  %v2678_v6 = vld [vmem:[#allocation3 + $0x3ec] ss:$16 sps:$4 sm:$0xff]  }
  0xa0   :  { %1496 = vmatprep.subr.bf16.mxu1 %v2616_v8  ;;  %v2756_v7 = vld [vmem:[#allocation5 + $0x94] ss:$8 sps:$4 sm:$0xff]   ;;  %v2676_v8 = vld [vmem:[#allocation3 + $0x3e8] ss:$16 sps:$4 sm:$0xff]  }
  0xa2   :  { %1456 = vmatpush1.bf16.msra.mxu0 %v2611_v9  ;;  %v2754_v9 = vld [vmem:[#allocation5 + $0x90] ss:$8 sps:$4 sm:$0xff]  }
  0xa3   :  { %1497 = vmatpush1.bf16.msra.mxu1 %v2614_v10  ;;  %1457 = vmatprep.subr.bf16.mxu0 %v2619_v11  ;;  %v2681_v10 = vld [vmem:[#allocation3 + $0x40c] ss:$16 sps:$4 sm:$0xff]  }
  0xa4   :  { %1498 = vmatprep.subr.bf16.mxu1 %v2622_v12  ;;  %v2759_v11 = vld [vmem:[#allocation5 + $0xa4] ss:$8 sps:$4 sm:$0xff]   ;;  %v2679_v12 = vld [vmem:[#allocation3 + $0x408] ss:$16 sps:$4 sm:$0xff]  }
  0xa6   :  { %1458 = vmatpush1.bf16.msra.mxu0 %v2617_v13  ;;  %v2684_v13 = vld [vmem:[#allocation3 + $0x42c] ss:$16 sps:$4 sm:$0xff]  }
  0xa7   :  { %1499 = vmatpush1.bf16.msra.mxu1 %v2620_v14  ;;  %1459 = vmatprep.subr.bf16.mxu0 %v2625_v15  ;;  %v2757_v14 = vld [vmem:[#allocation5 + $0xa0] ss:$8 sps:$4 sm:$0xff]   ;;  %v2762_v15 = vld [vmem:[#allocation5 + $0xb4] ss:$8 sps:$4 sm:$0xff]  }
  0xa8   :  { %1500 = vmatprep.subr.bf16.mxu1 %v2628_v18  ;;  %v2682_v18 = vld [vmem:[#allocation3 + $0x428] ss:$16 sps:$4 sm:$0xff]  }
  0xaa   :  { %1460 = vmatpush1.bf16.msra.mxu0 %v2623_v19  ;;  %v2687_v19 = vld [vmem:[#allocation3 + $0x44c] ss:$16 sps:$4 sm:$0xff]  }
  0xab   :  { %1501 = vmatpush1.bf16.msra.mxu1 %v2626_v20  ;;  %2005 = vmatprep.subr.bf16.mxu0 %v2729_v36  ;;  %v2760_v20 = vld [vmem:[#allocation5 + $0xb0] ss:$8 sps:$4 sm:$0xff]   ;;  %v2702_v36 = vld [vmem:[#allocation3 + $0x4ec] ss:$16 sps:$4 sm:$0xff]  }
  0xac   :  { %1511 = vmatprep.subr.bf16.mxu1 %v2633_v21  ;;  %v2765_v21 = vld [vmem:[#allocation5 + $0xc4] ss:$8 sps:$4 sm:$0xff]  }
  0xad   :  { %1462 = vmatmul.mubr.bf16.vlgmr.msra.gmra.mrb[4].mxu0 %v2991_v23 }
  0xae   :  { %1503 = vmatmul.mubr.bf16.vlgmr.msra.gmra.mrb[0].mxu1 %v2972_v16  ;;  %v2651_v16 = vld [vmem:[#allocation3 + $0x2cc] ss:$16 sps:$4 sm:$0xff]   ;;  %2006 = vmatpush1.bf16.msra.mxu0 %v2727_v35 }
  0xaf   :  { %1512 = vmatpush1.bf16.msra.mxu1 %v2631_v22  ;;  %1543 = vmatprep.mubr.bf16.mxu1 %v2968_v59  ;;  %v2654_v59 = vld [vmem:[#allocation3 + $0x2ec] ss:$16 sps:$4 sm:$0xff]   ;;  %v2685_v22 = vld [vmem:[#allocation3 + $0x448] ss:$16 sps:$4 sm:$0xff]  }
  0xb0   :  { %1513 = vmatprep.subr.bf16.mxu1 %v2636_v24  ;;  %2007 = vmatprep.subr.bf16.mxu0 %v2732_v37  ;;  %v2690_v24 = vld [vmem:[#allocation3 + $0x46c] ss:$16 sps:$4 sm:$0xff]  }
  0xb2   :  { %2008 = vmatpush1.bf16.msra.mxu0 %v2730_v39  ;;  %v2772_v39 = vld [vmem:[#allocation5 + $0xf0] ss:$8 sps:$4 sm:$0xff]  }
  0xb3   :  { %1514 = vmatpush1.bf16.msra.mxu1 %v2634_v25  ;;  %2009 = vmatprep.subr.bf16.mxu0 %v2735_v41  ;;  %v2763_v25 = vld [vmem:[#allocation5 + $0xc0] ss:$8 sps:$4 sm:$0xff]   ;;  %v2705_v41 = vld [vmem:[#allocation3 + $0x50c] ss:$16 sps:$4 sm:$0xff]  }
  0xb4   :  { %1515 = vmatprep.subr.bf16.mxu1 %v2639_v26  ;;  %v2768_v26 = vld [vmem:[#allocation5 + $0xd4] ss:$8 sps:$4 sm:$0xff]  }
  0xb6   :  { %2010 = vmatpush1.bf16.msra.mxu0 %v2733_v44  ;;  %v2777_v44 = vld [vmem:[#allocation5 + $0x104] ss:$8 sps:$4 sm:$0xff]  }
  0xb7   :  { %1516 = vmatpush1.bf16.msra.mxu1 %v2637_v27  ;;  %2011 = vmatprep.subr.bf16.mxu0 %v2738_v46  ;;  %v2693_v27 = vld [vmem:[#allocation3 + $0x48c] ss:$16 sps:$4 sm:$0xff]   ;;  %v2706_v46 = vld [vmem:[#allocation3 + $0x528] ss:$16 sps:$4 sm:$0xff]  }
  0xb8   :  { %1517 = vmatprep.subr.bf16.mxu1 %v2642_v28  ;;  %v2691_v28 = vld [vmem:[#allocation3 + $0x488] ss:$16 sps:$4 sm:$0xff]  }
  0xba   :  { %2012 = vmatpush1.bf16.msra.mxu0 %v2736_v48  ;;  %v2709_v48 = vld [vmem:[#allocation3 + $0x548] ss:$16 sps:$4 sm:$0xff]  }
  0xbb   :  { %1518 = vmatpush1.bf16.msra.mxu1 %v2640_v29  ;;  %2013 = vmatprep.subr.bf16.mxu0 %v2741_v50  ;;  %v2696_v29 = vld [vmem:[#allocation3 + $0x4ac] ss:$16 sps:$4 sm:$0xff]   ;;  %v2712_v50 = vld [vmem:[#allocation3 + $0x568] ss:$16 sps:$4 sm:$0xff]  }
  0xbc   :  { %1519 = vmatprep.subr.bf16.mxu1 %v2645_v30  ;;  %v2694_v30 = vld [vmem:[#allocation3 + $0x4a8] ss:$16 sps:$4 sm:$0xff]  }
  0xbe   :  { %2014 = vmatpush1.bf16.msra.mxu0 %v2739_v52  ;;  %v2715_v52 = vld [vmem:[#allocation3 + $0x588] ss:$16 sps:$4 sm:$0xff]  }
  0xbf   :  { %1520 = vmatpush1.bf16.msra.mxu1 %v2643_v31  ;;  %2015 = vmatprep.subr.bf16.mxu0 %v2744_v54  ;;  %v2699_v31 = vld [vmem:[#allocation3 + $0x4cc] ss:$16 sps:$4 sm:$0xff]   ;;  %v2718_v54 = vld [vmem:[#allocation3 + $0x5a8] ss:$16 sps:$4 sm:$0xff]  }
  0xc0   :  { %1521 = vmatprep.subr.bf16.mxu1 %v2648_v32 }
  0xc2   :  { %2016 = vmatpush1.bf16.msra.mxu0 %v2742_v56  ;;  %v2721_v56 = vld [vmem:[#allocation3 + $0x5c8] ss:$16 sps:$4 sm:$0xff]  }
  0xc3   :  { %1522 = vmatpush1.bf16.msra.mxu1 %v2646_v33  ;;  %2017 = vmatprep.subr.bf16.mxu0 %v2747_v58  ;;  %v2771_v33 = vld [vmem:[#allocation5 + $0xe4] ss:$8 sps:$4 sm:$0xff]   ;;  %v2724_v58 = vld [vmem:[#allocation3 + $0x5e8] ss:$16 sps:$4 sm:$0xff]  }
  0xc4   :  { %1523 = vmatprep.subr.bf16.mxu1 %v2651_v16 }
  0xc6   :  { %2018 = vmatpush1.bf16.msra.mxu0 %v2745_v61 }
  0xc7   :  { %1524 = vmatpush1.bf16.msra.mxu1 %v2649_v34  ;;  %2019 = vmatprep.subr.bf16.mxu0 %v2750_v63  ;;  %v2769_v34 = vld [vmem:[#allocation5 + $0xe0] ss:$8 sps:$4 sm:$0xff]  }
  0xc8   :  { %1525 = vmatprep.subr.bf16.mxu1 %v2654_v59  ;;  %v2697_v59 = vld [vmem:[#allocation3 + $0x4c8] ss:$16 sps:$4 sm:$0xff]  }
  0xca   :  { %2020 = vmatpush1.bf16.msra.mxu0 %v2748_v1 }
  0xcb   :  { %1526 = vmatpush1.bf16.msra.mxu1 %v2652_v38  ;;  %2021 = vmatprep.subr.bf16.mxu0 %v2753_v3  ;;  %v2774_v38 = vld [vmem:[#allocation5 + $0xf4] ss:$8 sps:$4 sm:$0xff]  }
  0xcc   :  { %1527 = vmatprep.subr.bf16.mxu1 %v2657_v40  ;;  %v2700_v40 = vld [vmem:[#allocation3 + $0x4e8] ss:$16 sps:$4 sm:$0xff]  }
  0xce   :  { %2022 = vmatpush1.bf16.msra.mxu0 %v2751_v5 }
  0xcf   :  { %1528 = vmatpush1.bf16.msra.mxu1 %v2655_v43  ;;  %2023 = vmatprep.subr.bf16.mxu0 %v2756_v7  ;;  %v2703_v43 = vld [vmem:[#allocation3 + $0x508] ss:$16 sps:$4 sm:$0xff]  }
  0xd0   :  { %1529 = vmatprep.subr.bf16.mxu1 %v2660_v45  ;;  %v2708_v45 = vld [vmem:[#allocation3 + $0x52c] ss:$16 sps:$4 sm:$0xff]  }
  0xd2   :  { %2024 = vmatpush1.bf16.msra.mxu0 %v2754_v9 }
  0xd3   :  { %1530 = vmatpush1.bf16.msra.mxu1 %v2658_v47  ;;  %2025 = vmatprep.subr.bf16.mxu0 %v2759_v11  ;;  %v2711_v47 = vld [vmem:[#allocation3 + $0x54c] ss:$16 sps:$4 sm:$0xff]  }
  0xd4   :  { %1531 = vmatprep.subr.bf16.mxu1 %v2663_v49  ;;  %v2714_v49 = vld [vmem:[#allocation3 + $0x56c] ss:$16 sps:$4 sm:$0xff]  }
  0xd6   :  { %2026 = vmatpush1.bf16.msra.mxu0 %v2757_v14  ;;  %v2780_v14 = vld [vmem:[#allocation5 + $0x114] ss:$8 sps:$4 sm:$0xff]  }
  0xd7   :  { %1532 = vmatpush1.bf16.msra.mxu1 %v2661_v51  ;;  %2027 = vmatprep.subr.bf16.mxu0 %v2762_v15  ;;  %v2717_v51 = vld [vmem:[#allocation3 + $0x58c] ss:$16 sps:$4 sm:$0xff]   ;;  %v2778_v15 = vld [vmem:[#allocation5 + $0x110] ss:$8 sps:$4 sm:$0xff]  }
  0xd8   :  { %1533 = vmatprep.subr.bf16.mxu1 %v2666_v53  ;;  %v2720_v53 = vld [vmem:[#allocation3 + $0x5ac] ss:$16 sps:$4 sm:$0xff]  }
  0xda   :  { %2028 = vmatpush1.bf16.msra.mxu0 %v2760_v20  ;;  %v2786_v20 = vld [vmem:[#allocation5 + $0x134] ss:$8 sps:$4 sm:$0xff]  }
  0xdb   :  { %1534 = vmatpush1.bf16.msra.mxu1 %v2664_v55  ;;  %2029 = vmatprep.subr.bf16.mxu0 %v2765_v21  ;;  %v2723_v55 = vld [vmem:[#allocation3 + $0x5cc] ss:$16 sps:$4 sm:$0xff]   ;;  %v2784_v21 = vld [vmem:[#allocation5 + $0x130] ss:$8 sps:$4 sm:$0xff]  }
  0xdc   :  { %1535 = vmatprep.subr.bf16.mxu1 %v2669_v57  ;;  %v2726_v57 = vld [vmem:[#allocation3 + $0x5ec] ss:$16 sps:$4 sm:$0xff]  }
  0xde   :  { %2030 = vmatpush1.bf16.msra.mxu0 %v2763_v25  ;;  %v2792_v25 = vld [vmem:[#allocation5 + $0x154] ss:$8 sps:$4 sm:$0xff]  }
  0xdf   :  { %1536 = vmatpush1.bf16.msra.mxu1 %v2667_v60  ;;  %2031 = vmatprep.subr.bf16.mxu0 %v2768_v26  ;;  %v2790_v26 = vld [vmem:[#allocation5 + $0x150] ss:$8 sps:$4 sm:$0xff]  }
  0xe0   :  { %1537 = vmatprep.subr.bf16.mxu1 %v2672_v62 }
  0xe3   :  { %1538 = vmatpush1.bf16.msra.mxu1 %v2670_v0 }
  0xe4   :  { %1539 = vmatprep.subr.bf16.mxu1 %v2675_v2 }
  0xe7   :  { %1540 = vmatpush1.bf16.msra.mxu1 %v2673_v4 }
  0xe8   :  { %1541 = vmatprep.subr.bf16.mxu1 %v2678_v6 }
  0xeb   :  { %1542 = vmatpush1.bf16.msra.mxu1 %v2676_v8 }
  0xec   :  { %1552 = vmatprep.subr.bf16.mxu1 %v2681_v10 }
  0xee   :  { %1544 = vmatmul.mubr.bf16.vlgmr.msra.gmra.mrb[0].mxu1 %v2974_v17  ;;  %v2688_v17 = vld [vmem:[#allocation3 + $0x468] ss:$16 sps:$4 sm:$0xff]  }
  0xef   :  { %1553 = vmatpush1.bf16.msra.mxu1 %v2679_v12  ;;  %1584 = vmatprep.mubr.bf16.mxu1 %v2986_v42  ;;  %v2766_v42 = vld [vmem:[#allocation5 + $0xd0] ss:$8 sps:$4 sm:$0xff]  }
  0xf0   :  { %1554 = vmatprep.subr.bf16.mxu1 %v2684_v13  ;;  %2032 = vmatpush1.bf16.msra.mxu0 %v2766_v42  ;;  %v2798_v42 = vld [vmem:[#allocation5 + $0x174] ss:$8 sps:$4 sm:$0xff]  }
  0xf1   :  { %2033 = vmatprep.subr.bf16.mxu0 %v2771_v33  ;;  %v2807_v33 = vld [vmem:[#allocation5 + $0x1a4] ss:$8 sps:$4 sm:$0xff]  }
  0xf3   :  { %1555 = vmatpush1.bf16.msra.mxu1 %v2682_v18  ;;  %v2783_v18 = vld [vmem:[#allocation5 + $0x124] ss:$8 sps:$4 sm:$0xff]  }
  0xf4   :  { %1556 = vmatprep.subr.bf16.mxu1 %v2687_v19  ;;  %2034 = vmatpush1.bf16.msra.mxu0 %v2769_v34  ;;  %v2781_v19 = vld [vmem:[#allocation5 + $0x120] ss:$8 sps:$4 sm:$0xff]   ;;  %v2810_v34 = vld [vmem:[#allocation5 + $0x1b4] ss:$8 sps:$4 sm:$0xff]  }
  0xf5   :  { %2035 = vmatprep.subr.bf16.mxu0 %v2774_v38  ;;  %v2814_v38 = vld [vmem:[#allocation5 + $0x1d0] ss:$8 sps:$4 sm:$0xff]  }
  0xf7   :  { %1557 = vmatpush1.bf16.msra.mxu1 %v2685_v22  ;;  %v2789_v22 = vld [vmem:[#allocation5 + $0x144] ss:$8 sps:$4 sm:$0xff]  }
  0xf8   :  { %1558 = vmatprep.subr.bf16.mxu1 %v2690_v24  ;;  %2036 = vmatpush1.bf16.msra.mxu0 %v2772_v39  ;;  %v2787_v24 = vld [vmem:[#allocation5 + $0x140] ss:$8 sps:$4 sm:$0xff]   ;;  %v2819_v39 = vld [vmem:[#allocation5 + $0x1e4] ss:$8 sps:$4 sm:$0xff]  }
  0xf9   :  { %2046 = vmatprep.subr.bf16.mxu0 %v2777_v44 }
  0xfb   :  { %1559 = vmatpush1.bf16.msra.mxu1 %v2688_v17  ;;  %v2795_v17 = vld [vmem:[#allocation5 + $0x164] ss:$8 sps:$4 sm:$0xff]  }
  0xfc   :  { %1560 = vmatprep.subr.bf16.mxu1 %v2693_v27  ;;  %v2793_v27 = vld [vmem:[#allocation5 + $0x160] ss:$8 sps:$4 sm:$0xff]  }
  0xff   :  { %1561 = vmatpush1.bf16.msra.mxu1 %v2691_v28  ;;  %v2796_v28 = vld [vmem:[#allocation5 + $0x170] ss:$8 sps:$4 sm:$0xff]  }
 0x100   :  { %1562 = vmatprep.subr.bf16.mxu1 %v2696_v29  ;;  %v318_v32 = vpop.f32.mrb[0].mxu0  ;;  %v2801_v29 = vld [vmem:[#allocation5 + $0x184] ss:$8 sps:$4 sm:$0xff]  }
 0x101   :  { %v320_v16 = vpop.f32.mrb[1].mxu0 }
 0x102   :  { %v322_v35 = vpop.f32.mrb[2].mxu0 }
 0x103   :  { %1563 = vmatpush1.bf16.msra.mxu1 %v2694_v30  ;;  %v323_v37 = vpop.f32.mrb[3].mxu0  ;;  %v2799_v30 = vld [vmem:[#allocation5 + $0x180] ss:$8 sps:$4 sm:$0xff]   ;;  %v2813_v35 = vld [vmem:[#allocation5 + $0x1c4] ss:$8 sps:$4 sm:$0xff]  }
 0x104   :  { %1564 = vmatprep.subr.bf16.mxu1 %v2699_v31  ;;  %v2804_v31 = vld [vmem:[#allocation5 + $0x194] ss:$8 sps:$4 sm:$0xff]  }
 0x105   :  { %v2816_v37 = vld [vmem:[#allocation5 + $0x1d4] ss:$8 sps:$4 sm:$0xff]  }
 0x107   :  { %1565 = vmatpush1.bf16.msra.mxu1 %v2697_v59  ;;  %v2808_v59 = vld [vmem:[#allocation5 + $0x1b0] ss:$8 sps:$4 sm:$0xff]  }
 0x108   :  { %1566 = vmatprep.subr.bf16.mxu1 %v2702_v36  ;;  %v2811_v36 = vld [vmem:[#allocation5 + $0x1c0] ss:$8 sps:$4 sm:$0xff]  }
 0x10b   :  { %1567 = vmatpush1.bf16.msra.mxu1 %v2700_v40  ;;  %v2817_v40 = vld [vmem:[#allocation5 + $0x1e0] ss:$8 sps:$4 sm:$0xff]  }
 0x10c   :  { %1568 = vmatprep.subr.bf16.mxu1 %v2705_v41  ;;  %v2822_v41 = vld [vmem:[#allocation5 + $0x1f4] ss:$8 sps:$4 sm:$0xff]  }
 0x10f   :  { %1569 = vmatpush1.bf16.msra.mxu1 %v2703_v43  ;;  %v2820_v43 = vld [vmem:[#allocation5 + $0x1f0] ss:$8 sps:$4 sm:$0xff]  }
 0x110   :  { %1570 = vmatprep.subr.bf16.mxu1 %v2708_v45 }
 0x113   :  { %1571 = vmatpush1.bf16.msra.mxu1 %v2706_v46 }
 0x114   :  { %1572 = vmatprep.subr.bf16.mxu1 %v2711_v47 }
 0x117   :  { %1573 = vmatpush1.bf16.msra.mxu1 %v2709_v48 }
 0x118   :  { %1574 = vmatprep.subr.bf16.mxu1 %v2714_v49 }
 0x11b   :  { %1575 = vmatpush1.bf16.msra.mxu1 %v2712_v50 }
 0x11c   :  { %1576 = vmatprep.subr.bf16.mxu1 %v2717_v51 }
 0x11f   :  { %1577 = vmatpush1.bf16.msra.mxu1 %v2715_v52 }
 0x120   :  { %1578 = vmatprep.subr.bf16.mxu1 %v2720_v53 }
 0x123   :  { %1579 = vmatpush1.bf16.msra.mxu1 %v2718_v54  ;;  %v1675_v54 = vlaneseq }
 0x124   :  { %1580 = vmatprep.subr.bf16.mxu1 %v2723_v55 }
 0x125   :  { %v1676_v55 = vshrl.u32 %v1675_v54, 7 }
 0x127   :  { %1581 = vmatpush1.bf16.msra.mxu1 %v2721_v56  ;;  %v1677_v56 = vsub.s32 0, %v1676_v55 }
 0x128   :  { %1582 = vmatprep.subr.bf16.mxu1 %v2726_v57  ;;  %v1673_v57 = vld [vmem:[%s3016_s5] sm:$0x3] }
 0x12b   :  { %1583 = vmatpush1.bf16.msra.mxu1 %v2724_v58  ;;  %v1681_v58 = vsub.s32 1, %v1676_v55 }
 0x12e   :  { %1585 = vmatmul.mubr.bf16.vlgmr.msra.gmra.mrb[0].mxu1 %v2991_v23  ;;  %v2775_v23 = vld [vmem:[#allocation5 + $0x100] ss:$8 sps:$4 sm:$0xff]  }
 0x141   :  { %v1381_v60 = vpop.f32.mrb[4].mxu1 }
 0x142   :  { %v1382_v61 = vadd.f32 %v1381_v60, %v318_v32  ;;  %v1383_v62 = vpop.f32.mrb[5].mxu1  ;;  %v2802_v32 = vld [vmem:[#allocation5 + $0x190] ss:$8 sps:$4 sm:$0xff]   ;;  %v1678_v60 = vrot.slane %v1673_v57, %v1677_v56 }
 0x143   :  { %v1384_v63 = vadd.f32 %v1383_v62, %v320_v16  ;;  %v1385_v0 = vpop.f32.mrb[6].mxu1  ;;  %v2805_v16 = vld [vmem:[#allocation5 + $0x1a0] ss:$8 sps:$4 sm:$0xff]  }
 0x144   :  { %v1386_v1 = vpop.f32.mrb[7].mxu1  ;;  %v2093_v62 = vld [vmem:[%s3017_s6] sm:$0x3] }
 0x180   :  { %v1463_v2 = vpop.f32.mrb[4].mxu0 }
 0x181   :  { %v2397_v3 = vadd.f32 %v1463_v2, %v1382_v61  ;;  %v1465_v4 = vpop.f32.mrb[5].mxu0  ;;  %v1682_v61 = vrot.slane %v1673_v57, %v1681_v58 }
 0x182   :  { %v2399_v5 = vadd.f32 %v1465_v4, %v1384_v63  ;;  %v1467_v6 = vpop.f32.mrb[6].mxu0  ;;  %v2098_v4 = vrot.slane %v2093_v62, %v1677_v56 }
 0x183   :  { %vm1593_vm2 = vcmp.ge.f32.partialorder %v2397_v3, 0.0  ;;  %v1597_v7 = vmul.f32 0.2, %v2397_v3  ;;  %v1468_v8 = vpop.f32.mrb[7].mxu0 }
 0x184   :  { %vm1594_vm3 = vcmp.ge.f32.partialorder %v2399_v5, 0.0  ;;  %v1598_v9 = vmul.f32 0.2, %v2399_v5 }
 0x185   :  { %v1601_v10 = vsel %vm1593_vm2, %v2397_v3, %v1597_v7  ;;  %v2102_v7 = vrot.slane %v2093_v62, %v1681_v58 }
 0x186   :  { %v1602_v11 = vsel %vm1594_vm3, %v2399_v5, %v1598_v9  ;;  %v1605_v13 = vpack.c.bf16 %v1601_v10, %v1601_v10 }
 0x187   :  { %v1606_v12 = vpack.c.bf16 %v1602_v11, %v1602_v11 }
 0x189   :  { %2037 = vmatprep.mubr.bf16.mxu0 %v1606_v12 }
 0x18a   :  { %2038 = vmatmul.mubr.bf16.vlgmr.msra.gmra.mrb[8].mxu0 %v1605_v13  ;;  %v2111_v13 = vstv %s3018_s7 }
 0x18b   :  { %2047 = vmatpush1.bf16.msra.mxu0 %v2775_v23 }
 0x18c   :  { %2048 = vmatprep.subr.bf16.mxu0 %v2780_v14 }
 0x18f   :  { %2049 = vmatpush1.bf16.msra.mxu0 %v2778_v15 }
 0x190   :  { %2050 = vmatprep.subr.bf16.mxu0 %v2783_v18 }
 0x193   :  { %2051 = vmatpush1.bf16.msra.mxu0 %v2781_v19 }
 0x194   :  { %2052 = vmatprep.subr.bf16.mxu0 %v2786_v20 }
 0x197   :  { %2053 = vmatpush1.bf16.msra.mxu0 %v2784_v21 }
 0x198   :  { %2054 = vmatprep.subr.bf16.mxu0 %v2789_v22 }
 0x19b   :  { %2055 = vmatpush1.bf16.msra.mxu0 %v2787_v24 }
 0x19c   :  { %2056 = vmatprep.subr.bf16.mxu0 %v2792_v25 }
 0x19f   :  { %2057 = vmatpush1.bf16.msra.mxu0 %v2790_v26 }
 0x1a0   :  { %2058 = vmatprep.subr.bf16.mxu0 %v2795_v17 }
 0x1a3   :  { %2059 = vmatpush1.bf16.msra.mxu0 %v2793_v27 }
 0x1a4   :  { %2060 = vmatprep.subr.bf16.mxu0 %v2798_v42 }
 0x1a7   :  { %2061 = vmatpush1.bf16.msra.mxu0 %v2796_v28 }
 0x1a8   :  { %2062 = vmatprep.subr.bf16.mxu0 %v2801_v29 }
 0x1ab   :  { %2063 = vmatpush1.bf16.msra.mxu0 %v2799_v30 }
 0x1ac   :  { %2064 = vmatprep.subr.bf16.mxu0 %v2804_v31 }
 0x1af   :  { %2065 = vmatpush1.bf16.msra.mxu0 %v2802_v32 }
 0x1b0   :  { %2066 = vmatprep.subr.bf16.mxu0 %v2807_v33 }
 0x1b3   :  { %2067 = vmatpush1.bf16.msra.mxu0 %v2805_v16 }
 0x1b4   :  { %2068 = vmatprep.subr.bf16.mxu0 %v2810_v34 }
 0x1b7   :  { %2069 = vmatpush1.bf16.msra.mxu0 %v2808_v59 }
 0x1b8   :  { %2070 = vmatprep.subr.bf16.mxu0 %v2813_v35 }
 0x1bb   :  { %2071 = vmatpush1.bf16.msra.mxu0 %v2811_v36 }
 0x1bc   :  { %2072 = vmatprep.subr.bf16.mxu0 %v2816_v37 }
 0x1bf   :  { %2073 = vmatpush1.bf16.msra.mxu0 %v2814_v38 }
 0x1c0   :  { %2074 = vmatprep.subr.bf16.mxu0 %v2819_v39 }
 0x1c3   :  { %2075 = vmatpush1.bf16.msra.mxu0 %v2817_v40 }
 0x1c4   :  { %2076 = vmatprep.subr.bf16.mxu0 %v2822_v41 }
 0x1c7   :  { %2077 = vmatpush1.bf16.msra.mxu0 %v2820_v43 }
 0x201   :  { %v1586_v44 = vpop.f32.mrb[0].mxu1 }
 0x202   :  { %vm1595_vm4 = vcmp.ge.f32.partialorder %v1586_v44, 0.0  ;;  %v1599_v45 = vmul.f32 0.2, %v1586_v44  ;;  %v1588_v46 = vpop.f32.mrb[1].mxu1 }
 0x203   :  { %vm1596_vm5 = vcmp.ge.f32.partialorder %v1588_v46, 0.0  ;;  %v1600_v47 = vmul.f32 0.2, %v1588_v46  ;;  %v1590_v48 = vpop.f32.mrb[2].mxu1 }
 0x204   :  { %v1603_v49 = vsel %vm1595_vm4, %v1586_v44, %v1599_v45  ;;  %v1591_v50 = vpop.f32.mrb[3].mxu1 }
 0x205   :  { %v1604_v51 = vsel %vm1596_vm5, %v1588_v46, %v1600_v47  ;;  %v1607_v53 = vpack.c.bf16 %v1603_v49, %v1603_v49 }
 0x206   :  { %v1608_v52 = vpack.c.bf16 %v1604_v51, %v1604_v51 }
 0x208   :  { %2078 = vmatprep.mubr.bf16.mxu0 %v1608_v52 }
 0x209   :  { %2079 = vmatmul.mubr.bf16.vlgmr.msra.gmra.mrb[8].mxu0 %v1607_v53 }
 0x2dc   :  { %v2080_v63 = vpop.f32.mrb[8].mxu0 }
 0x2dd   :  { %v2400_v0 = vadd.f32 %v2080_v63, %v1678_v60  ;;  %v2082_v1 = vpop.f32.mrb[9].mxu0 }
 0x2de   :  { %v2401_v2 = vadd.f32 %v2082_v1, %v1682_v61  ;;  %v2084_v3 = vpop.f32.mrb[10].mxu0 }
 0x2df   :  { %vm2087_vm6 = vcmp.ge.f32.partialorder %v2400_v0, 0.0  ;;  %v2089_v5 = vmul.f32 0.2, %v2400_v0  ;;  %v2085_v6 = vpop.f32.mrb[11].mxu0 }
 0x2e0   :  { %vm2088_vm7 = vcmp.ge.f32.partialorder %v2401_v2, 0.0  ;;  %v2090_v8 = vmul.f32 0.2, %v2401_v2 }
 0x2e1   :  { %v2091_v9 = vsel %vm2087_vm6, %v2400_v0, %v2089_v5 }
 0x2e2   :  { %v2092_v10 = vsel %vm2088_vm7, %v2401_v2, %v2090_v8  ;;  %v2105_v11 = vmul.f32 %v2098_v4, %v2091_v9 }
 0x2e3   :  { %v2106_v12 = vmul.f32 %v2102_v7, %v2092_v10 }
 0x2e5   :  { %v2107_v23 = vadd.f32 %v2106_v12, %v2105_v11 }
 0x2e7   :  { %2108 = vadd.xlane.f32.xlu0 %v2107_v23 }
 0x374   :  { %v2109_v14 = vpop.xlane.xlu0 %2108 }
 0x375   :  { %v2112_v15 = vadd.f32 %v2111_v13, %v2109_v14 }
 0x377   :  { %v2113_v18 = vsub.f32 0.0, %v2112_v15 }
 0x379   :  { %v2114_v19 = vmul.f32 1.442695, %v2113_v18 }
 0x37b   :  { %2823 = vpow2.f32 %v2114_v19 }
 0x385   :  { %v2824_v20 = vpop.eup %2823 }
 0x386   :  { %v2116_v21 = vadd.f32 1.0, %v2824_v20 }
 0x388   :  { %2825 = vrcp.f32 %v2116_v21 }
 0x392   :  { %v2826_v22 = vpop.eup %2825 }
 0x393   :  { %2119 = vst.msk [vmem:[%s3019_s8] sm:$0xff] %vm2118_vm8, %v2826_v22 }
 0x394   :  { %2124 = vsyncpa [#allocation4], 1 }
 0x395   :  { %2125 = vsyncpa [#allocation6], 1 }

</bundles_post_ra>
